<compile_context>
chip_gen: v7x
topology: tpu7x:2x2x1
jax: 0.10.0
libtpu: 0.0.40
codegen_flags: <defaults>
</compile_context>

<pallas_src>
import functools

import jax
import jax.numpy as jnp
from jax.experimental import pallas as pl
from jax.experimental.pallas import tpu as pltpu


# ------------------------------ helpers --------------------------------------

def _round_up(x, m):
    return ((x + m - 1) // m) * m


def _pick_m_tile(M):
    """Largest aligned row tile that still yields >=2 grid programs (pipelining /
    megacore); else the largest aligned divisor; else the whole axis."""
    for t in (256, 128, 64, 32, 16, 8):
        if M % t == 0 and M // t >= 2:
            return t
    for t in (256, 128, 64, 32, 16, 8):
        if M % t == 0:
            return t
    return M


def _make_sel(B, N):
    """sel[m, n] = c' index ({0,1}) that the PyTorch .view/.permute scramble
    assigns to state element (b = m % B, node n, c = m // B).  Constant-folded
    by XLA at trace time."""
    m = jnp.arange(2 * B, dtype=jnp.int32)[:, None]
    n = jnp.arange(N, dtype=jnp.int32)[None, :]
    c = m // B
    b = m % B
    return ((2 * ((b * N + n) % B) + c) // B).astype(jnp.float32)


def _scramble_readout(u_acc, B, N):
    """Finish the scrambled Linear: layout-only regroup + 2-way add of the small
    (2B, N) accumulator into the (B, N) gate pre-activation.
    # TODO(synk): this pure permutation stays in XLA; moving it in-kernel needs a
    # cross-lane relayout Mosaic does not express cleanly for arbitrary B, N.
    """
    flat = u_acc.reshape(2, B, N).transpose(1, 2, 0).reshape(-1)   # (b, n, c) order
    return flat.reshape(N, 2, B).sum(axis=1).T                     # (B, N)


# ------------------------------ fused kernel ---------------------------------

def _diffusion_linear_kernel(wa_ref, wd_ref, s0_ref, k_ref, sel_ref, u_ref, *,
                             num_outs, num_kernels, max_diffusion_step, k_tot,
                             compute_dtype):
    """Chebyshev-style diffusion recursion fused with the scrambled-Linear readout.

    wa_ref : (num_outs*k_tot,) SMEM   -- w[o, s]
    wd_ref : (num_outs*k_tot,) SMEM   -- w[o, k_tot+s] - w[o, s]
    s0_ref : (m_tile, N) f32, rows m = c*B + b, lane-dense over graph nodes.
    k_ref  : (num_kernels, N, N) pre-transposed kernels (x_next = x @ K^T).
    sel_ref: (m_tile, N) 0/1 selector mask (applied once in the epilogue).
    u_ref  : (num_outs, m_tile, N) per-gate weighted accumulators.
    """
    x0 = s0_ref[...]                              # f32 carry
    acc_a = [wa_ref[o * k_tot] * x0 for o in range(num_outs)]
    acc_d = [wd_ref[o * k_tot] * x0 for o in range(num_outs)]
    step = 1
    for kidx in range(num_kernels):
        ker = k_ref[kidx]                         # (N, N), already transposed
        x1 = jnp.dot(x0.astype(compute_dtype), ker,
                     preferred_element_type=jnp.float32)
        for o in range(num_outs):
            acc_a[o] = acc_a[o] + wa_ref[o * k_tot + step] * x1
            acc_d[o] = acc_d[o] + wd_ref[o * k_tot + step] * x1
        step += 1
        for _ in range(2, max_diffusion_step + 1):
            x2 = 2.0 * jnp.dot(x1.astype(compute_dtype), ker,
                               preferred_element_type=jnp.float32) - x0
            for o in range(num_outs):
                acc_a[o] = acc_a[o] + wa_ref[o * k_tot + step] * x2
                acc_d[o] = acc_d[o] + wd_ref[o * k_tot + step] * x2
            step += 1
            x1, x0 = x2, x1                       # same carry-over as PyTorch loop
    sel = sel_ref[...]
    for o in range(num_outs):
        u_ref[o] = acc_a[o] + sel * acc_d[o]


def _fused_diffusion_linear(s0, kernels_t, sel, w_a, w_d, *, num_outs,
                            num_kernels, max_diffusion_step, k_tot,
                            compute_dtype):
    """One fused pass: diffusion on s0 + weighted per-step accumulation."""
    M, N = s0.shape
    m_tile = _pick_m_tile(M)
    grid = (M // m_tile,)

    kernel = functools.partial(
        _diffusion_linear_kernel, num_outs=num_outs, num_kernels=num_kernels,
        max_diffusion_step=max_diffusion_step, k_tot=k_tot,
        compute_dtype=compute_dtype)

    k_bytes = kernels_t.size * kernels_t.dtype.itemsize
    flops = (2 * M * N * N * num_kernels * max_diffusion_step
             + 6 * num_outs * M * N * k_tot)
    bytes_accessed = (k_bytes + s0.size * 4 + sel.size * 4
                      + num_outs * M * N * 4 + (w_a.size + w_d.size) * 4)

    # VMEM budget: K^T single-buffered + double-buffered state/sel/output tiles,
    # 2x headroom for compiler spill scratch, capped at v7x's 64 MiB physical.
    tile_bytes = 2 * (2 * m_tile * N * 4) + 2 * (num_outs * m_tile * N * 4)
    vmem_limit = int(min(max(2 * (k_bytes + tile_bytes), 32 << 20), 64 << 20))

    return pl.pallas_call(
        kernel,
        out_shape=jax.ShapeDtypeStruct((num_outs, M, N), jnp.float32),
        grid=grid,
        in_specs=[
            pl.BlockSpec(memory_space=pltpu.MemorySpace.SMEM),        # w_a
            pl.BlockSpec(memory_space=pltpu.MemorySpace.SMEM),        # w_d
            pl.BlockSpec((m_tile, N), lambda i: (i, 0)),              # state rows
            pl.BlockSpec((num_kernels, N, N), lambda i: (0, 0, 0),
                         pipeline_mode=pl.Buffered(1)),               # K^T resident
            pl.BlockSpec((m_tile, N), lambda i: (i, 0)),              # selector mask
        ],
        out_specs=pl.BlockSpec((num_outs, m_tile, N), lambda i: (0, i, 0)),
        compiler_params=pltpu.CompilerParams(
            dimension_semantics=("parallel",),
            vmem_limit_bytes=vmem_limit),
        cost_estimate=pl.CostEstimate(flops=int(flops), transcendentals=0,
                                      bytes_accessed=int(bytes_accessed)),
    )(w_a, w_d, s0, kernels_t, sel)


# ------------------------------ cell forward ---------------------------------

def graph_conv_gru_cell(inp, hidden, kernels, w1, b1, w2, b2,
                        w_lin=None, b_lin=None, max_diffusion_step=2,
                        use_bf16_matmul=True):
    """Forward of GraphConvGRUCell.

    Faithful to the original PyTorch forward: the candidate gate C reuses
    gconv2's parameters (gconv3 is constructed but never used there), and the
    GraphDiffusionConv .view/.permute scramble before its Linear is reproduced
    exactly.  Returns (output, new_hidden).
    """
    B, N = inp.shape
    num_kernels = kernels.shape[0]
    k_tot = num_kernels * max_diffusion_step + 1
    compute_dtype = jnp.bfloat16 if use_bf16_matmul else jnp.float32

    # Lane-pad the node axis to a multiple of 128 for large ragged graphs
    # (full MXU columns, unmasked stores); toy sizes stay untouched.  Padded
    # columns are exactly zero through the whole recursion and sliced off.
    n_pad_to = _round_up(N, 128) if (N >= 128 and N % 128 != 0) else N
    pad_n = n_pad_to - N

    # Pre-transpose K on the host so the kernel contracts (1),(0): x_next = x @ K^T
    # with no in-kernel relayout of the NxN operand.
    kernels_t = jnp.swapaxes(kernels, 1, 2)
    if pad_n:
        kernels_t = jnp.pad(kernels_t, ((0, 0), (0, pad_n), (0, pad_n)))
    kernels_t = kernels_t.astype(compute_dtype)

    sel = _make_sel(B, N)                                          # (2B, N)
    if pad_n:
        sel = jnp.pad(sel, ((0, 0), (0, pad_n)))
        inp_p = jnp.pad(inp, ((0, 0), (0, pad_n)))
        hid_p = jnp.pad(hidden, ((0, 0), (0, pad_n)))
    else:
        inp_p, hid_p = inp, hidden

    # Linear weights, split into base (A) and delta (D) halves for the deferred blend.
    w_ru = jnp.stack([w1.reshape(-1), w2.reshape(-1)], axis=0)     # (2, 2*k_tot)
    wa_ru = w_ru[:, :k_tot].reshape(-1)
    wd_ru = (w_ru[:, k_tot:] - w_ru[:, :k_tot]).reshape(-1)
    w_c = w2.reshape(1, -1)
    wa_c = w_c[:, :k_tot].reshape(-1)
    wd_c = (w_c[:, k_tot:] - w_c[:, :k_tot]).reshape(-1)

    # Pass 1: shared diffusion on [input; hidden] -> r and u pre-activations.
    s0 = jnp.concatenate([inp_p, hid_p], axis=0)                   # (2B, N_pad)
    u_ru = _fused_diffusion_linear(
        s0, kernels_t, sel, wa_ru, wd_ru, num_outs=2,
        num_kernels=num_kernels, max_diffusion_step=max_diffusion_step,
        k_tot=k_tot, compute_dtype=compute_dtype)
    u_ru_r = u_ru[0][:, :N]
    u_ru_u = u_ru[1][:, :N]
    r = jax.nn.sigmoid(_scramble_readout(u_ru_r, B, N) + b1[0])
    u = jax.nn.sigmoid(_scramble_readout(u_ru_u, B, N) + b2[0])

    # Pass 2: only the r*hidden rows need new diffusion; the input-row
    # contribution to gconv2's accumulator is exactly u_ru[1][:B] (same weights,
    # same input rows, same kernels) -> zero numerical change, ~25% fewer FLOPs.
    rh = r * hidden
    rh_p = jnp.pad(rh, ((0, 0), (0, pad_n))) if pad_n else rh
    u_c_hid = _fused_diffusion_linear(
        rh_p, kernels_t, sel[B:], wa_c, wd_c, num_outs=1,
        num_kernels=num_kernels, max_diffusion_step=max_diffusion_step,
        k_tot=k_tot, compute_dtype=compute_dtype)[0]
    u_c_full = jnp.concatenate([u_ru_u[:B], u_c_hid[:, :N]], axis=0)
    c_gate = jnp.tanh(_scramble_readout(u_c_full, B, N) + b2[0])

    h_new = u * hidden + (1.0 - u) * c_gate
    output = h_new
    if w_lin is not None:
        # Only taken when hidden_size != input_size.
        # TODO(synk): trivial (B,N)@(N,H) dense readout left to XLA.
        output = h_new @ w_lin.T + b_lin
    return output, h_new


# ----------------------------- pure-JAX reference ----------------------------

def _gdc_reference(inp, hid, kernels_list, weight, bias, max_diffusion_step):
    """Line-by-line transcription of GraphDiffusionConv.forward (incl. scramble)."""
    B, N = inp.shape
    num_inputs = 2
    x0 = jnp.stack([inp, hid], axis=2)                             # (B, N, 2)
    xs = [x0]
    for ker in kernels_list:
        x1 = jnp.einsum('ij,bjc->bic', ker, x0)
        xs.append(x1)
        for _ in range(2, max_diffusion_step + 1):
            x2 = 2.0 * jnp.einsum('ij,bjc->bic', ker, x1) - x0
            xs.append(x2)
            x1, x0 = x2, x1
    k_tot = len(kernels_list) * max_diffusion_step + 1
    x = jnp.stack(xs, axis=0)                                      # (k_tot, B, N, 2)
    x = x.reshape(k_tot, N, num_inputs, B)
    x = jnp.transpose(x, (3, 1, 2, 0))
    x = x.reshape(B * N, num_inputs * k_tot)
    x = x @ weight.T + bias
    return x.reshape(B, N)


def _cell_reference(inp, hid, kernels_list, w1, b1, w2, b2, max_diffusion_step):
    r = jax.nn.sigmoid(_gdc_reference(inp, hid, kernels_list, w1, b1,
                                      max_diffusion_step))
    u = jax.nn.sigmoid(_gdc_reference(inp, hid, kernels_list, w2, b2,
                                      max_diffusion_step))
    c_gate = jnp.tanh(_gdc_reference(inp, r * hid, kernels_list, w2, b2,
                                     max_diffusion_step))
    h_new = u * hid + (1.0 - u) * c_gate
    return h_new, h_new


# ----------------------------------- main ------------------------------------

def _run_case(key, B, N, num_kernels, K, use_bf16, rtol, atol):
    k_tot = num_kernels * K + 1
    ks = jax.random.split(key, 7)
    inp = jax.random.normal(ks[0], (B, N), dtype=jnp.float32)
    hid = jax.random.normal(ks[1], (B, N), dtype=jnp.float32)
    kernels = 0.1 * jax.random.normal(ks[2], (num_kernels, N, N),
                                      dtype=jnp.float32)
    bound = 1.0 / float(jnp.sqrt(2.0 * k_tot))
    w1 = jax.random.uniform(ks[3], (1, 2 * k_tot), minval=-bound, maxval=bound,
                            dtype=jnp.float32)
    b1 = jax.random.uniform(ks[4], (1,), minval=-bound, maxval=bound,
                            dtype=jnp.float32)
    w2 = jax.random.uniform(ks[5], (1, 2 * k_tot), minval=-bound, maxval=bound,
                            dtype=jnp.float32)
    b2 = jax.random.uniform(ks[6], (1,), minval=-bound, maxval=bound,
                            dtype=jnp.float32)

    cell = jax.jit(functools.partial(graph_conv_gru_cell, max_diffusion_step=K,
                                     use_bf16_matmul=use_bf16))
    out, h_new = cell(inp, hid, kernels, w1, b1, w2, b2)
    out, h_new = jax.block_until_ready((out, h_new))

    ref_out, ref_h = _cell_reference(
        inp, hid, [kernels[i] for i in range(num_kernels)], w1, b1, w2, b2, K)
    assert out.shape == (B, N)
    err = float(jnp.max(jnp.abs(out - ref_out)))
    assert jnp.allclose(out, ref_out, rtol=rtol, atol=atol), f"max abs err {err}"
    assert jnp.allclose(h_new, ref_h, rtol=rtol, atol=atol)


if __name__ == "__main__":
    key = jax.random.PRNGKey(0)
    k_a, k_b, k_c = jax.random.split(key, 3)
    # Strict f32 checks (validate scramble/sel/pass-2 reuse logic exactly).
    _run_case(k_a, B=2, N=16, num_kernels=2, K=2, use_bf16=False,
              rtol=1e-4, atol=1e-4)
    _run_case(k_b, B=3, N=8, num_kernels=1, K=3, use_bf16=False,
              rtol=1e-4, atol=1e-4)
    # Larger ragged node count (exercises 128-lane padding): f32 then bf16 MXU
    # operands (precision trade-off -> loosened tolerance).
    _run_case(k_c, B=4, N=160, num_kernels=2, K=2, use_bf16=False,
              rtol=5e-2, atol=5e-2)
    _run_case(k_c, B=4, N=160, num_kernels=2, K=2, use_bf16=True,
              rtol=1e-1, atol=1e-1)
    print("KERNEL_OK")
</pallas_src>

<mosaic_0001>
module attributes {stable_mosaic.version = 11 : i64} {
  func.func @_diffusion_linear_kernel(%arg0: i32, %arg1: memref<5xf32, #tpu.memory_space<smem>>, %arg2: memref<5xf32, #tpu.memory_space<smem>>, %arg3: memref<2x16xf32, #tpu.memory_space<vmem>>, %arg4: memref<2x16x16xf32, #tpu.memory_space<vmem>>, %arg5: memref<2x16xf32, #tpu.memory_space<vmem>>, %arg6: memref<1x2x16xf32, #tpu.memory_space<vmem>>) attributes {dimension_semantics = [#tpu.dimension_semantics<parallel>], iteration_bounds = array<i64: 1>, scalar_prefetch = 0 : i64, scratch_operands = 0 : i64, tpu.core_type = #tpu.core_type<tc>, window_params = [{transform_indices = @transform_0, window_bounds = array<i64: 5>}, {transform_indices = @transform_1, window_bounds = array<i64: 5>}, {transform_indices = @transform_2, window_bounds = array<i64: 2, 16>}, {pipeline_mode = #tpu.pipeline_mode<synchronous>, transform_indices = @transform_3, window_bounds = array<i64: 2, 16, 16>}, {transform_indices = @transform_4, window_bounds = array<i64: 2, 16>}, {transform_indices = @transform_5, window_bounds = array<i64: 1, 2, 16>}]} {
    %c0 = arith.constant 0 : index
    %c0_0 = arith.constant 0 : index
    %0 = vector.load %arg3[%c0, %c0_0] : memref<2x16xf32, #tpu.memory_space<vmem>>, vector<2x16xf32>
    %c0_1 = arith.constant 0 : index
    %1 = memref.load %arg1[%c0_1] : memref<5xf32, #tpu.memory_space<smem>>
    %2 = vector.broadcast %1 : f32 to vector<2x16xf32>
    %3 = arith.mulf %2, %0 : vector<2x16xf32>
    %c0_2 = arith.constant 0 : index
    %4 = memref.load %arg2[%c0_2] : memref<5xf32, #tpu.memory_space<smem>>
    %5 = vector.broadcast %4 : f32 to vector<2x16xf32>
    %6 = arith.mulf %5, %0 : vector<2x16xf32>
    %c0_3 = arith.constant 0 : index
    %c0_4 = arith.constant 0 : index
    %c0_5 = arith.constant 0 : index
    %7 = vector.load %arg4[%c0_3, %c0_4, %c0_5] : memref<2x16x16xf32, #tpu.memory_space<vmem>>, vector<1x16x16xf32>
    %8 = vector.shape_cast %7 : vector<1x16x16xf32> to vector<16x16xf32>
    %cst = arith.constant dense<0.000000e+00> : vector<2x16xf32>
    %9 = tpu.matmul %0, %8, %cst {dimension_numbers = #tpu.dot_dimension_numbers<[1], [0], [0], [1], [0, 0, 1, 1], [], []>} : vector<2x16xf32>, vector<16x16xf32>, vector<2x16xf32> -> vector<2x16xf32>
    %c1 = arith.constant 1 : index
    %10 = memref.load %arg1[%c1] : memref<5xf32, #tpu.memory_space<smem>>
    %11 = vector.broadcast %10 : f32 to vector<2x16xf32>
    %12 = arith.mulf %11, %9 : vector<2x16xf32>
    %13 = arith.addf %3, %12 : vector<2x16xf32>
    %c1_6 = arith.constant 1 : index
    %14 = memref.load %arg2[%c1_6] : memref<5xf32, #tpu.memory_space<smem>>
    %15 = vector.broadcast %14 : f32 to vector<2x16xf32>
    %16 = arith.mulf %15, %9 : vector<2x16xf32>
    %17 = arith.addf %6, %16 : vector<2x16xf32>
    %cst_7 = arith.constant dense<0.000000e+00> : vector<2x16xf32>
    %18 = tpu.matmul %9, %8, %cst_7 {dimension_numbers = #tpu.dot_dimension_numbers<[1], [0], [0], [1], [0, 0, 1, 1], [], []>} : vector<2x16xf32>, vector<16x16xf32>, vector<2x16xf32> -> vector<2x16xf32>
    %cst_8 = arith.constant 2.000000e+00 : f32
    %19 = vector.broadcast %cst_8 : f32 to vector<2x16xf32>
    %20 = arith.mulf %19, %18 : vector<2x16xf32>
    %21 = arith.subf %20, %0 : vector<2x16xf32>
    %c2 = arith.constant 2 : index
    %22 = memref.load %arg1[%c2] : memref<5xf32, #tpu.memory_space<smem>>
    %23 = vector.broadcast %22 : f32 to vector<2x16xf32>
    %24 = arith.mulf %23, %21 : vector<2x16xf32>
    %25 = arith.addf %13, %24 : vector<2x16xf32>
    %c2_9 = arith.constant 2 : index
    %26 = memref.load %arg2[%c2_9] : memref<5xf32, #tpu.memory_space<smem>>
    %27 = vector.broadcast %26 : f32 to vector<2x16xf32>
    %28 = arith.mulf %27, %21 : vector<2x16xf32>
    %29 = arith.addf %17, %28 : vector<2x16xf32>
    %c1_10 = arith.constant 1 : index
    %c0_11 = arith.constant 0 : index
    %c0_12 = arith.constant 0 : index
    %30 = vector.load %arg4[%c1_10, %c0_11, %c0_12] : memref<2x16x16xf32, #tpu.memory_space<vmem>>, vector<1x16x16xf32>
    %31 = vector.shape_cast %30 : vector<1x16x16xf32> to vector<16x16xf32>
    %cst_13 = arith.constant dense<0.000000e+00> : vector<2x16xf32>
    %32 = tpu.matmul %9, %31, %cst_13 {dimension_numbers = #tpu.dot_dimension_numbers<[1], [0], [0], [1], [0, 0, 1, 1], [], []>} : vector<2x16xf32>, vector<16x16xf32>, vector<2x16xf32> -> vector<2x16xf32>
    %c3 = arith.constant 3 : index
    %33 = memref.load %arg1[%c3] : memref<5xf32, #tpu.memory_space<smem>>
    %34 = vector.broadcast %33 : f32 to vector<2x16xf32>
    %35 = arith.mulf %34, %32 : vector<2x16xf32>
    %36 = arith.addf %25, %35 : vector<2x16xf32>
    %c3_14 = arith.constant 3 : index
    %37 = memref.load %arg2[%c3_14] : memref<5xf32, #tpu.memory_space<smem>>
    %38 = vector.broadcast %37 : f32 to vector<2x16xf32>
    %39 = arith.mulf %38, %32 : vector<2x16xf32>
    %40 = arith.addf %29, %39 : vector<2x16xf32>
    %cst_15 = arith.constant dense<0.000000e+00> : vector<2x16xf32>
    %41 = tpu.matmul %32, %31, %cst_15 {dimension_numbers = #tpu.dot_dimension_numbers<[1], [0], [0], [1], [0, 0, 1, 1], [], []>} : vector<2x16xf32>, vector<16x16xf32>, vector<2x16xf32> -> vector<2x16xf32>
    %cst_16 = arith.constant 2.000000e+00 : f32
    %42 = vector.broadcast %cst_16 : f32 to vector<2x16xf32>
    %43 = arith.mulf %42, %41 : vector<2x16xf32>
    %44 = arith.subf %43, %9 : vector<2x16xf32>
    %c4 = arith.constant 4 : index
    %45 = memref.load %arg1[%c4] : memref<5xf32, #tpu.memory_space<smem>>
    %46 = vector.broadcast %45 : f32 to vector<2x16xf32>
    %47 = arith.mulf %46, %44 : vector<2x16xf32>
    %48 = arith.addf %36, %47 : vector<2x16xf32>
    %c4_17 = arith.constant 4 : index
    %49 = memref.load %arg2[%c4_17] : memref<5xf32, #tpu.memory_space<smem>>
    %50 = vector.broadcast %49 : f32 to vector<2x16xf32>
    %51 = arith.mulf %50, %44 : vector<2x16xf32>
    %52 = arith.addf %40, %51 : vector<2x16xf32>
    %c0_18 = arith.constant 0 : index
    %c0_19 = arith.constant 0 : index
    %53 = vector.load %arg5[%c0_18, %c0_19] : memref<2x16xf32, #tpu.memory_space<vmem>>, vector<2x16xf32>
    %54 = arith.mulf %53, %52 : vector<2x16xf32>
    %55 = arith.addf %48, %54 : vector<2x16xf32>
    %c0_20 = arith.constant 0 : index
    %c0_21 = arith.constant 0 : index
    %c0_22 = arith.constant 0 : index
    %56 = vector.load %arg6[%c0_20, %c0_21, %c0_22] : memref<1x2x16xf32, #tpu.memory_space<vmem>>, vector<1x2x16xf32>
    %57 = vector.shape_cast %56 : vector<1x2x16xf32> to vector<2x16xf32>
    %58 = vector.shape_cast %55 : vector<2x16xf32> to vector<1x2x16xf32>
    tpu.vector_store %arg6[%c0_20, %c0_21, %c0_22], %58 {strides = array<i32>} : memref<1x2x16xf32, #tpu.memory_space<vmem>>, vector<1x2x16xf32>,
    return
  }
  func.func @transform_0(%arg0: i32) -> i32 {
    %c0_i32 = arith.constant 0 : i32
    %c0_i32_0 = arith.constant 0 : i32
    return %c0_i32 : i32
  }
  func.func @transform_1(%arg0: i32) -> i32 {
    %c0_i32 = arith.constant 0 : i32
    %c0_i32_0 = arith.constant 0 : i32
    return %c0_i32 : i32
  }
  func.func @transform_2(%arg0: i32) -> (i32, i32) {
    %c0_i32 = arith.constant 0 : i32
    %c0_i32_0 = arith.constant 0 : i32
    return %arg0, %c0_i32 : i32, i32
  }
  func.func @transform_3(%arg0: i32) -> (i32, i32, i32) {
    %c0_i32 = arith.constant 0 : i32
    %c0_i32_0 = arith.constant 0 : i32
    %c0_i32_1 = arith.constant 0 : i32
    %c0_i32_2 = arith.constant 0 : i32
    return %c0_i32, %c0_i32_0, %c0_i32_1 : i32, i32, i32
  }
  func.func @transform_4(%arg0: i32) -> (i32, i32) {
    %c0_i32 = arith.constant 0 : i32
    %c0_i32_0 = arith.constant 0 : i32
    return %arg0, %c0_i32 : i32, i32
  }
  func.func @transform_5(%arg0: i32) -> (i32, i32, i32) {
    %c0_i32 = arith.constant 0 : i32
    %c0_i32_0 = arith.constant 0 : i32
    %c0_i32_1 = arith.constant 0 : i32
    return %c0_i32, %arg0, %c0_i32_0 : i32, i32, i32
  }
}

module attributes {stable_mosaic.version = 11 : i64} {
  func.func @_diffusion_linear_kernel(%arg0: i32, %arg1: memref<10xf32, #tpu.memory_space<smem>>, %arg2: memref<10xf32, #tpu.memory_space<smem>>, %arg3: memref<4x16xf32, #tpu.memory_space<vmem>>, %arg4: memref<2x16x16xf32, #tpu.memory_space<vmem>>, %arg5: memref<4x16xf32, #tpu.memory_space<vmem>>, %arg6: memref<2x4x16xf32, #tpu.memory_space<vmem>>) attributes {dimension_semantics = [#tpu.dimension_semantics<parallel>], iteration_bounds = array<i64: 1>, scalar_prefetch = 0 : i64, scratch_operands = 0 : i64, tpu.core_type = #tpu.core_type<tc>, window_params = [{transform_indices = @transform_0, window_bounds = array<i64: 10>}, {transform_indices = @transform_1, window_bounds = array<i64: 10>}, {transform_indices = @transform_2, window_bounds = array<i64: 4, 16>}, {pipeline_mode = #tpu.pipeline_mode<synchronous>, transform_indices = @transform_3, window_bounds = array<i64: 2, 16, 16>}, {transform_indices = @transform_4, window_bounds = array<i64: 4, 16>}, {transform_indices = @transform_5, window_bounds = array<i64: 2, 4, 16>}]} {
    %c0 = arith.constant 0 : index
    %c0_0 = arith.constant 0 : index
    %0 = vector.load %arg3[%c0, %c0_0] : memref<4x16xf32, #tpu.memory_space<vmem>>, vector<4x16xf32>
    %c0_1 = arith.constant 0 : index
    %1 = memref.load %arg1[%c0_1] : memref<10xf32, #tpu.memory_space<smem>>
    %2 = vector.broadcast %1 : f32 to vector<4x16xf32>
    %3 = arith.mulf %2, %0 : vector<4x16xf32>
    %c5 = arith.constant 5 : index
    %4 = memref.load %arg1[%c5] : memref<10xf32, #tpu.memory_space<smem>>
    %5 = vector.broadcast %4 : f32 to vector<4x16xf32>
    %6 = arith.mulf %5, %0 : vector<4x16xf32>
    %c0_2 = arith.constant 0 : index
    %7 = memref.load %arg2[%c0_2] : memref<10xf32, #tpu.memory_space<smem>>
    %8 = vector.broadcast %7 : f32 to vector<4x16xf32>
    %9 = arith.mulf %8, %0 : vector<4x16xf32>
    %c5_3 = arith.constant 5 : index
    %10 = memref.load %arg2[%c5_3] : memref<10xf32, #tpu.memory_space<smem>>
    %11 = vector.broadcast %10 : f32 to vector<4x16xf32>
    %12 = arith.mulf %11, %0 : vector<4x16xf32>
    %c0_4 = arith.constant 0 : index
    %c0_5 = arith.constant 0 : index
    %c0_6 = arith.constant 0 : index
    %13 = vector.load %arg4[%c0_4, %c0_5, %c0_6] : memref<2x16x16xf32, #tpu.memory_space<vmem>>, vector<1x16x16xf32>
    %14 = vector.shape_cast %13 : vector<1x16x16xf32> to vector<16x16xf32>
    %cst = arith.constant dense<0.000000e+00> : vector<4x16xf32>
    %15 = tpu.matmul %0, %14, %cst {dimension_numbers = #tpu.dot_dimension_numbers<[1], [0], [0], [1], [0, 0, 1, 1], [], []>} : vector<4x16xf32>, vector<16x16xf32>, vector<4x16xf32> -> vector<4x16xf32>
    %c1 = arith.constant 1 : index
    %16 = memref.load %arg1[%c1] : memref<10xf32, #tpu.memory_space<smem>>
    %17 = vector.broadcast %16 : f32 to vector<4x16xf32>
    %18 = arith.mulf %17, %15 : vector<4x16xf32>
    %19 = arith.addf %3, %18 : vector<4x16xf32>
    %c1_7 = arith.constant 1 : index
    %20 = memref.load %arg2[%c1_7] : memref<10xf32, #tpu.memory_space<smem>>
    %21 = vector.broadcast %20 : f32 to vector<4x16xf32>
    %22 = arith.mulf %21, %15 : vector<4x16xf32>
    %23 = arith.addf %9, %22 : vector<4x16xf32>
    %c6 = arith.constant 6 : index
    %24 = memref.load %arg1[%c6] : memref<10xf32, #tpu.memory_space<smem>>
    %25 = vector.broadcast %24 : f32 to vector<4x16xf32>
    %26 = arith.mulf %25, %15 : vector<4x16xf32>
    %27 = arith.addf %6, %26 : vector<4x16xf32>
    %c6_8 = arith.constant 6 : index
    %28 = memref.load %arg2[%c6_8] : memref<10xf32, #tpu.memory_space<smem>>
    %29 = vector.broadcast %28 : f32 to vector<4x16xf32>
    %30 = arith.mulf %29, %15 : vector<4x16xf32>
    %31 = arith.addf %12, %30 : vector<4x16xf32>
    %cst_9 = arith.constant dense<0.000000e+00> : vector<4x16xf32>
    %32 = tpu.matmul %15, %14, %cst_9 {dimension_numbers = #tpu.dot_dimension_numbers<[1], [0], [0], [1], [0, 0, 1, 1], [], []>} : vector<4x16xf32>, vector<16x16xf32>, vector<4x16xf32> -> vector<4x16xf32>
    %cst_10 = arith.constant 2.000000e+00 : f32
    %33 = vector.broadcast %cst_10 : f32 to vector<4x16xf32>
    %34 = arith.mulf %33, %32 : vector<4x16xf32>
    %35 = arith.subf %34, %0 : vector<4x16xf32>
    %c2 = arith.constant 2 : index
    %36 = memref.load %arg1[%c2] : memref<10xf32, #tpu.memory_space<smem>>
    %37 = vector.broadcast %36 : f32 to vector<4x16xf32>
    %38 = arith.mulf %37, %35 : vector<4x16xf32>
    %39 = arith.addf %19, %38 : vector<4x16xf32>
    %c2_11 = arith.constant 2 : index
    %40 = memref.load %arg2[%c2_11] : memref<10xf32, #tpu.memory_space<smem>>
    %41 = vector.broadcast %40 : f32 to vector<4x16xf32>
    %42 = arith.mulf %41, %35 : vector<4x16xf32>
    %43 = arith.addf %23, %42 : vector<4x16xf32>
    %c7 = arith.constant 7 : index
    %44 = memref.load %arg1[%c7] : memref<10xf32, #tpu.memory_space<smem>>
    %45 = vector.broadcast %44 : f32 to vector<4x16xf32>
    %46 = arith.mulf %45, %35 : vector<4x16xf32>
    %47 = arith.addf %27, %46 : vector<4x16xf32>
    %c7_12 = arith.constant 7 : index
    %48 = memref.load %arg2[%c7_12] : memref<10xf32, #tpu.memory_space<smem>>
    %49 = vector.broadcast %48 : f32 to vector<4x16xf32>
    %50 = arith.mulf %49, %35 : vector<4x16xf32>
    %51 = arith.addf %31, %50 : vector<4x16xf32>
    %c1_13 = arith.constant 1 : index
    %c0_14 = arith.constant 0 : index
    %c0_15 = arith.constant 0 : index
    %52 = vector.load %arg4[%c1_13, %c0_14, %c0_15] : memref<2x16x16xf32, #tpu.memory_space<vmem>>, vector<1x16x16xf32>
    %53 = vector.shape_cast %52 : vector<1x16x16xf32> to vector<16x16xf32>
    %cst_16 = arith.constant dense<0.000000e+00> : vector<4x16xf32>
    %54 = tpu.matmul %15, %53, %cst_16 {dimension_numbers = #tpu.dot_dimension_numbers<[1], [0], [0], [1], [0, 0, 1, 1], [], []>} : vector<4x16xf32>, vector<16x16xf32>, vector<4x16xf32> -> vector<4x16xf32>
    %c3 = arith.constant 3 : index
    %55 = memref.load %arg1[%c3] : memref<10xf32, #tpu.memory_space<smem>>
    %56 = vector.broadcast %55 : f32 to vector<4x16xf32>
    %57 = arith.mulf %56, %54 : vector<4x16xf32>
    %58 = arith.addf %39, %57 : vector<4x16xf32>
    %c3_17 = arith.constant 3 : index
    %59 = memref.load %arg2[%c3_17] : memref<10xf32, #tpu.memory_space<smem>>
    %60 = vector.broadcast %59 : f32 to vector<4x16xf32>
    %61 = arith.mulf %60, %54 : vector<4x16xf32>
    %62 = arith.addf %43, %61 : vector<4x16xf32>
    %c8 = arith.constant 8 : index
    %63 = memref.load %arg1[%c8] : memref<10xf32, #tpu.memory_space<smem>>
    %64 = vector.broadcast %63 : f32 to vector<4x16xf32>
    %65 = arith.mulf %64, %54 : vector<4x16xf32>
    %66 = arith.addf %47, %65 : vector<4x16xf32>
    %c8_18 = arith.constant 8 : index
    %67 = memref.load %arg2[%c8_18] : memref<10xf32, #tpu.memory_space<smem>>
    %68 = vector.broadcast %67 : f32 to vector<4x16xf32>
    %69 = arith.mulf %68, %54 : vector<4x16xf32>
    %70 = arith.addf %51, %69 : vector<4x16xf32>
    %cst_19 = arith.constant dense<0.000000e+00> : vector<4x16xf32>
    %71 = tpu.matmul %54, %53, %cst_19 {dimension_numbers = #tpu.dot_dimension_numbers<[1], [0], [0], [1], [0, 0, 1, 1], [], []>} : vector<4x16xf32>, vector<16x16xf32>, vector<4x16xf32> -> vector<4x16xf32>
    %cst_20 = arith.constant 2.000000e+00 : f32
    %72 = vector.broadcast %cst_20 : f32 to vector<4x16xf32>
    %73 = arith.mulf %72, %71 : vector<4x16xf32>
    %74 = arith.subf %73, %15 : vector<4x16xf32>
    %c4 = arith.constant 4 : index
    %75 = memref.load %arg1[%c4] : memref<10xf32, #tpu.memory_space<smem>>
    %76 = vector.broadcast %75 : f32 to vector<4x16xf32>
    %77 = arith.mulf %76, %74 : vector<4x16xf32>
    %78 = arith.addf %58, %77 : vector<4x16xf32>
    %c4_21 = arith.constant 4 : index
    %79 = memref.load %arg2[%c4_21] : memref<10xf32, #tpu.memory_space<smem>>
    %80 = vector.broadcast %79 : f32 to vector<4x16xf32>
    %81 = arith.mulf %80, %74 : vector<4x16xf32>
    %82 = arith.addf %62, %81 : vector<4x16xf32>
    %c9 = arith.constant 9 : index
    %83 = memref.load %arg1[%c9] : memref<10xf32, #tpu.memory_space<smem>>
    %84 = vector.broadcast %83 : f32 to vector<4x16xf32>
    %85 = arith.mulf %84, %74 : vector<4x16xf32>
    %86 = arith.addf %66, %85 : vector<4x16xf32>
    %c9_22 = arith.constant 9 : index
    %87 = memref.load %arg2[%c9_22] : memref<10xf32, #tpu.memory_space<smem>>
    %88 = vector.broadcast %87 : f32 to vector<4x16xf32>
    %89 = arith.mulf %88, %74 : vector<4x16xf32>
    %90 = arith.addf %70, %89 : vector<4x16xf32>
    %c0_23 = arith.constant 0 : index
    %c0_24 = arith.constant 0 : index
    %91 = vector.load %arg5[%c0_23, %c0_24] : memref<4x16xf32, #tpu.memory_space<vmem>>, vector<4x16xf32>
    %92 = arith.mulf %91, %82 : vector<4x16xf32>
    %93 = arith.addf %78, %92 : vector<4x16xf32>
    %c0_25 = arith.constant 0 : index
    %c0_26 = arith.constant 0 : index
    %c0_27 = arith.constant 0 : index
    %94 = vector.load %arg6[%c0_25, %c0_26, %c0_27] : memref<2x4x16xf32, #tpu.memory_space<vmem>>, vector<1x4x16xf32>
    %95 = vector.shape_cast %94 : vector<1x4x16xf32> to vector<4x16xf32>
    %96 = vector.shape_cast %93 : vector<4x16xf32> to vector<1x4x16xf32>
    tpu.vector_store %arg6[%c0_25, %c0_26, %c0_27], %96 {strides = array<i32>} : memref<2x4x16xf32, #tpu.memory_space<vmem>>, vector<1x4x16xf32>,
    %97 = arith.mulf %91, %90 : vector<4x16xf32>
    %98 = arith.addf %86, %97 : vector<4x16xf32>
    %c1_28 = arith.constant 1 : index
    %c0_29 = arith.constant 0 : index
    %c0_30 = arith.constant 0 : index
    %99 = vector.load %arg6[%c1_28, %c0_29, %c0_30] : memref<2x4x16xf32, #tpu.memory_space<vmem>>, vector<1x4x16xf32>
    %100 = vector.shape_cast %99 : vector<1x4x16xf32> to vector<4x16xf32>
    %101 = vector.shape_cast %98 : vector<4x16xf32> to vector<1x4x16xf32>
    tpu.vector_store %arg6[%c1_28, %c0_29, %c0_30], %101 {strides = array<i32>} : memref<2x4x16xf32, #tpu.memory_space<vmem>>, vector<1x4x16xf32>,
    return
  }
  func.func @transform_0(%arg0: i32) -> i32 {
    %c0_i32 = arith.constant 0 : i32
    %c0_i32_0 = arith.constant 0 : i32
    return %c0_i32 : i32
  }
  func.func @transform_1(%arg0: i32) -> i32 {
    %c0_i32 = arith.constant 0 : i32
    %c0_i32_0 = arith.constant 0 : i32
    return %c0_i32 : i32
  }
  func.func @transform_2(%arg0: i32) -> (i32, i32) {
    %c0_i32 = arith.constant 0 : i32
    %c0_i32_0 = arith.constant 0 : i32
    return %arg0, %c0_i32 : i32, i32
  }
  func.func @transform_3(%arg0: i32) -> (i32, i32, i32) {
    %c0_i32 = arith.constant 0 : i32
    %c0_i32_0 = arith.constant 0 : i32
    %c0_i32_1 = arith.constant 0 : i32
    %c0_i32_2 = arith.constant 0 : i32
    return %c0_i32, %c0_i32_0, %c0_i32_1 : i32, i32, i32
  }
  func.func @transform_4(%arg0: i32) -> (i32, i32) {
    %c0_i32 = arith.constant 0 : i32
    %c0_i32_0 = arith.constant 0 : i32
    return %arg0, %c0_i32 : i32, i32
  }
  func.func @transform_5(%arg0: i32) -> (i32, i32, i32) {
    %c0_i32 = arith.constant 0 : i32
    %c0_i32_0 = arith.constant 0 : i32
    %c0_i32_1 = arith.constant 0 : i32
    return %c0_i32, %arg0, %c0_i32_0 : i32, i32, i32
  }
}

</mosaic_0001>

<bundles_post_ra>
// kernel: graph_conv_gru_cell.3
= control target key start
LH: loop header
LB: loop body
LE: loop exit
PB: predicated region body
PF: predicated region fallthrough
CT: control target
= control target key end

     0   :  { %10 = vsyncpa [#allocation3], 0  ;;  %s563_s0 = inlined_call_operand.vmem [shape: f32[5], index: 0, kind: input, shape index: {}]   ;;  %s564_s1 = inlined_call_operand.vmem [shape: f32[5], index: 1, kind: input, shape index: {}]   ;;  %s565_s2 = inlined_call_operand.vmem [shape: f32[2,16], index: 2, kind: input, shape index: {}]   ;;  %s566_s3 = inlined_call_operand.vmem [shape: f32[2,16,16], index: 3, kind: input, shape index: {}]   ;;  %s567_s4 = inlined_call_operand.vmem [shape: f32[2,16], index: 4, kind: input, shape index: {}]   ;;  %s568_s5 = inlined_call_operand.vmem [shape: f32[1,2,16], index: 5, kind: output, shape index: {}]  }
   0x1   :  { %s18_s20 = sshll.u32 %s563_s0, 4  ;;  %s19_s20 = int_to_ptr.vmem [resolvable:$true] %s18_s20 }
   0x2   :  { %11 = vsyncpa [#allocation5], 0  ;;  %s28_s23 = sshll.u32 %s564_s1, 4  ;;  %s465_s24 = scalar_lea.vmem %s19_s20, 16  ;;  %s29_s23 = int_to_ptr.vmem [resolvable:$true] %s28_s23 }
   0x3   :  { %p466_p0 = scmp.ne.s32.totalorder %s19_s20, %s465_s24  ;;  %p470_p1 = scmp.lt.s32.totalorder %s19_s20, %s19_s20 }
   0x4   :  { %p471_p2 = scmp.lt.s32.totalorder %s465_s24, %s465_s24 }
   0x6   :  { %p472_p3 = por %p471_p2, %p470_p1 }
   0x8   :  { %p473_p4 = pnand %p472_p3, %p466_p0 }
   0xa   :  { %476 = shalt.err (!%p473_p4)
}
   0xb   :  { %s493_s25 = smov [#allocation2]   ;;  %s477_s26 = scalar_lea.vmem %s29_s23, 16 }
   0xc   :  { %21 = dma.vmem_to_smem %s19_s20, 16, %s493_s25, [#allocation3]  }
   0xd   :  { %p478_p5 = scmp.ne.s32.totalorder %s29_s23, %s477_s26  ;;  %p482_p6 = scmp.lt.s32.totalorder %s29_s23, %s29_s23 }
   0xe   :  { %p483_p7 = scmp.lt.s32.totalorder %s477_s26, %s477_s26 }
  0x10   :  { %p484_p8 = por %p483_p7, %p482_p6 }
  0x12   :  { %p485_p9 = pnand %p484_p8, %p478_p5 }
  0x14   :  { %488 = shalt.err (!%p485_p9)
}
  0x15   :  { %s494_s0 = smov [#allocation4]  }
  0x16   :  { %31 = dma.vmem_to_smem %s29_s23, 16, %s494_s0, [#allocation5]  }
  0x17   :  { %489 = dma.done.wait [#allocation3], 16  }
  0x18   :  { %490 = vsyncadd [#allocation3], 4294967280 }
  0x19   :  { %491 = dma.done.wait [#allocation5], 16  }
  0x1a   :  { %492 = vsyncadd [#allocation5], 4294967280 }
  0x1b   :  { %44 = sfence }
  0x1c   :  { %v52_v0 = vld [vmem:[%s566_s3] sm:$0xff]  ;;  %v53_v1 = vld [vmem:[%s566_s3 + $0x8] sm:$0xff]  ;;  %v495_v2 = vmov 0.0|0.0   ;;  %vm496_vm0 = vmmov 0   ;;  %v497_v4 = vmov 0.0   ;;  %v400_v5 = vld [vmem:[%s566_s3 + $0x10] sm:$0xff] }
  0x1d   :  { %448 = vmatprep.subr.bf16.mxu0 %v495_v2  ;;  %v449_v3 = vpack.c.bf16 %v53_v1, %v52_v0  ;;  %424 = vmatprep.mubr.msk.f32.mxu0 %vm496_vm0, %v497_v4  ;;  %v401_v6 = vld [vmem:[%s566_s3 + $0x18] sm:$0xff]  ;;  %v45_v7 = vld [vmem:[%s565_s2] sm:$0x3]  ;;  %vm54_vm1 = vcmask 130048   ;;  %s46_s2 = sld [smem:[#allocation2]]  ;;  %s395_s11 = sld [smem:[#allocation2 + $0x1]] }
  0x1e   :  { %451 = vmatprep.subr.bf16.mxu1 %v495_v2  ;;  %431 = vmatprep.mubr.msk.f32.mxu1 %vm496_vm0, %v497_v4  ;;  %v455_v8 = vpack.c.bf16 %v401_v6, %v400_v5  ;;  %s49_s3 = sld [smem:[#allocation4]]  ;;  %s396_s12 = sld [smem:[#allocation4 + $0x1]]  ;;  %v383_v47 = vld [vmem:[%s567_s4] sm:$0x3]  ;;  %vm386_vm2 = vcmask 123904  }
  0x1f   :  { %450 = vmatpush3.bf16.msra.mxu0 %v449_v3  ;;  %453 = vmatpush3.bf16.msra.mxu1 %v449_v3  ;;  %s398_s13 = sld [smem:[#allocation2 + $0x2]]  ;;  %s403_s15 = sld [smem:[#allocation2 + $0x3]] }
  0x20   :  { %454 = vmatprep.subr.bf16.mxu0 %v495_v2  ;;  %457 = vmatprep.subr.bf16.mxu1 %v495_v2  ;;  %s399_s14 = sld [smem:[#allocation4 + $0x2]]  ;;  %s404_s16 = sld [smem:[#allocation4 + $0x3]] }
  0x21   :  { %s406_s17 = sld [smem:[#allocation2 + $0x4]] }
  0x22   :  { %425 = vmatmul.mubr.msk.f32.vlgmr.msra.gmra.mrb[0].mxu0 %vm54_vm1, %v45_v7  ;;  %s407_s18 = sld [smem:[#allocation4 + $0x4]] }
  0x23   :  { %456 = vmatpush3.bf16.msra.mxu0 %v455_v8  ;;  %438 = vmatprep.mubr.msk.f32.mxu0 %vm496_vm0, %v497_v4  ;;  %v47_v11 = vstv %s46_s2  ;;  %v129_v13 = vstv %s395_s11 }
  0x24   :  { %v50_v12 = vstv %s49_s3  ;;  %v133_v14 = vstv %s396_s12  ;;  %v48_v15 = vmul.f32 %v47_v11, %v45_v7 }
  0x25   :  { %v51_v18 = vmul.f32 %v50_v12, %v45_v7  ;;  %v212_v24 = vstv %s398_s13  ;;  %v293_v27 = vstv %s403_s15 }
  0x26   :  { %v216_v25 = vstv %s399_s14  ;;  %v297_v28 = vstv %s404_s16 }
  0x27   :  { %v376_v42 = vstv %s406_s17 }
  0x28   :  { %v380_v43 = vstv %s407_s18 }
  0xf5   :  { %v124_v9 = vpop.f32.mrb[0].mxu0 }
  0xf6   :  { %v426_v10 = vpop.f32.mrb[1].mxu0  ;;  %432 = vmatmul.mubr.msk.f32.vlgmr.msra.gmra.mrb[0].mxu1 %vm54_vm1, %v124_v9  ;;  %439 = vmatmul.mubr.msk.f32.vlgmr.msra.gmra.mrb[2].mxu0 %vm54_vm1, %v124_v9  ;;  %v130_v19 = vmul.f32 %v129_v13, %v124_v9  ;;  %v134_v20 = vmul.f32 %v133_v14, %v124_v9 }
  0xf7   :  { %459 = vmatpush3.bf16.msra.mxu1 %v455_v8  ;;  %445 = vmatprep.mubr.msk.f32.mxu1 %vm496_vm0, %v497_v4 }
  0xf8   :  { %v131_v29 = vadd.f32 %v130_v19, %v48_v15  ;;  %v135_v30 = vadd.f32 %v134_v20, %v51_v18 }
 0x1c9   :  { %v205_v16 = vpop.f32.mrb[0].mxu1  ;;  %v288_v17 = vpop.f32.mrb[2].mxu0 }
 0x1ca   :  { %v209_v21 = vmul.f32 2.0, %v205_v16  ;;  %v433_v22 = vpop.f32.mrb[1].mxu1  ;;  %v440_v23 = vpop.f32.mrb[3].mxu0  ;;  %446 = vmatmul.mubr.msk.f32.vlgmr.msra.gmra.mrb[2].mxu1 %vm54_vm1, %v288_v17  ;;  %v294_v35 = vmul.f32 %v293_v27, %v288_v17  ;;  %v298_v36 = vmul.f32 %v297_v28, %v288_v17 }
 0x1cc   :  { %v210_v26 = vsub.f32 %v209_v21, %v45_v7 }
 0x1ce   :  { %v213_v31 = vmul.f32 %v212_v24, %v210_v26  ;;  %v217_v32 = vmul.f32 %v216_v25, %v210_v26 }
 0x1d0   :  { %v214_v33 = vadd.f32 %v213_v31, %v131_v29  ;;  %v218_v34 = vadd.f32 %v217_v32, %v135_v30 }
 0x1d2   :  { %v295_v37 = vadd.f32 %v294_v35, %v214_v33  ;;  %v299_v38 = vadd.f32 %v298_v36, %v218_v34 }
 0x29d   :  { %v369_v39 = vpop.f32.mrb[2].mxu1 }
 0x29e   :  { %v373_v40 = vmul.f32 2.0, %v369_v39  ;;  %v447_v41 = vpop.f32.mrb[3].mxu1 }
 0x2a0   :  { %v374_v44 = vsub.f32 %v373_v40, %v124_v9 }
 0x2a2   :  { %v377_v45 = vmul.f32 %v376_v42, %v374_v44  ;;  %v381_v46 = vmul.f32 %v380_v43, %v374_v44 }
 0x2a4   :  { %v378_v48 = vadd.f32 %v377_v45, %v295_v37  ;;  %v382_v49 = vadd.f32 %v381_v46, %v299_v38 }
 0x2a6   :  { %v384_v50 = vmul.f32 %v383_v47, %v382_v49 }
 0x2a8   :  { %v385_v51 = vadd.f32 %v384_v50, %v378_v48 }
 0x2aa   :  { %387 = vst.msk [vmem:[%s568_s5] sm:$0x3] %vm386_vm2, %v385_v51 }
 0x2ab   :  { %392 = vsyncpa [#allocation3], 1 }
 0x2ac   :  { %393 = vsyncpa [#allocation5], 1 }

// kernel: graph_conv_gru_cell.2
= control target key start
LH: loop header
LB: loop body
LE: loop exit
PB: predicated region body
PF: predicated region fallthrough
CT: control target
= control target key end

     0   :  { %10 = vsyncpa [#allocation3], 0  ;;  %s652_s0 = inlined_call_operand.vmem [shape: f32[10], index: 0, kind: input, shape index: {}]   ;;  %s653_s1 = inlined_call_operand.vmem [shape: f32[10], index: 1, kind: input, shape index: {}]   ;;  %s654_s2 = inlined_call_operand.vmem [shape: f32[4,16], index: 2, kind: input, shape index: {}]   ;;  %s655_s3 = inlined_call_operand.vmem [shape: f32[2,16,16], index: 3, kind: input, shape index: {}]   ;;  %s656_s4 = inlined_call_operand.vmem [shape: f32[4,16], index: 4, kind: input, shape index: {}]   ;;  %s657_s5 = inlined_call_operand.vmem [shape: f32[2,4,16], index: 5, kind: output, shape index: {}]  }
   0x1   :  { %s18_s20 = sshll.u32 %s652_s0, 4  ;;  %s19_s20 = int_to_ptr.vmem [resolvable:$true] %s18_s20 }
   0x2   :  { %11 = vsyncpa [#allocation5], 0  ;;  %s28_s23 = sshll.u32 %s653_s1, 4  ;;  %s518_s24 = scalar_lea.vmem %s19_s20, 16  ;;  %s29_s23 = int_to_ptr.vmem [resolvable:$true] %s28_s23 }
   0x3   :  { %p519_p0 = scmp.ne.s32.totalorder %s19_s20, %s518_s24  ;;  %p523_p1 = scmp.lt.s32.totalorder %s19_s20, %s19_s20 }
   0x4   :  { %p524_p2 = scmp.lt.s32.totalorder %s518_s24, %s518_s24 }
   0x6   :  { %p525_p3 = por %p524_p2, %p523_p1 }
   0x8   :  { %p526_p4 = pnand %p525_p3, %p519_p0 }
   0xa   :  { %529 = shalt.err (!%p526_p4)
}
   0xb   :  { %s546_s25 = smov [#allocation2]   ;;  %s530_s26 = scalar_lea.vmem %s29_s23, 16 }
   0xc   :  { %21 = dma.vmem_to_smem %s19_s20, 16, %s546_s25, [#allocation3]  }
   0xd   :  { %p531_p5 = scmp.ne.s32.totalorder %s29_s23, %s530_s26  ;;  %p535_p6 = scmp.lt.s32.totalorder %s29_s23, %s29_s23 }
   0xe   :  { %p536_p7 = scmp.lt.s32.totalorder %s530_s26, %s530_s26 }
  0x10   :  { %p537_p8 = por %p536_p7, %p535_p6 }
  0x12   :  { %p538_p9 = pnand %p537_p8, %p531_p5 }
  0x14   :  { %541 = shalt.err (!%p538_p9)
}
  0x15   :  { %s547_s0 = smov [#allocation4]  }
  0x16   :  { %31 = dma.vmem_to_smem %s29_s23, 16, %s547_s0, [#allocation5]  }
  0x17   :  { %542 = dma.done.wait [#allocation3], 16  }
  0x18   :  { %543 = vsyncadd [#allocation3], 4294967280 }
  0x19   :  { %544 = dma.done.wait [#allocation5], 16  }
  0x1a   :  { %545 = vsyncadd [#allocation5], 4294967280 }
  0x1b   :  { %44 = sfence }
  0x1c   :  { %v58_v0 = vld [vmem:[%s655_s3] sm:$0xff]  ;;  %v59_v1 = vld [vmem:[%s655_s3 + $0x8] sm:$0xff]  ;;  %v548_v2 = vmov 0.0|0.0   ;;  %vm549_vm0 = vmmov 0   ;;  %v550_v4 = vmov 0.0   ;;  %v448_v5 = vld [vmem:[%s655_s3 + $0x10] sm:$0xff] }
  0x1d   :  { %501 = vmatprep.subr.bf16.mxu0 %v548_v2  ;;  %v502_v3 = vpack.c.bf16 %v59_v1, %v58_v0  ;;  %477 = vmatprep.mubr.msk.f32.mxu0 %vm549_vm0, %v550_v4  ;;  %v449_v6 = vld [vmem:[%s655_s3 + $0x18] sm:$0xff]  ;;  %v45_v7 = vld [vmem:[%s654_s2] sm:$0xf]  ;;  %vm60_vm1 = vcmask 130048   ;;  %s439_s2 = sld [smem:[#allocation2 + $0x1]]  ;;  %s46_s11 = sld [smem:[#allocation2]] }
  0x1e   :  { %504 = vmatprep.subr.bf16.mxu1 %v548_v2  ;;  %484 = vmatprep.mubr.msk.f32.mxu1 %vm549_vm0, %v550_v4  ;;  %v508_v8 = vpack.c.bf16 %v449_v6, %v448_v5  ;;  %s440_s3 = sld [smem:[#allocation4 + $0x1]]  ;;  %s436_s12 = sld [smem:[#allocation2 + $0x5]]  ;;  %vm424_vm2 = vcmask 125952  }
  0x1f   :  { %503 = vmatpush3.bf16.msra.mxu0 %v502_v3  ;;  %506 = vmatpush3.bf16.msra.mxu1 %v502_v3  ;;  %s52_s13 = sld [smem:[#allocation4]]  ;;  %s437_s14 = sld [smem:[#allocation4 + $0x5]] }
  0x20   :  { %507 = vmatprep.subr.bf16.mxu0 %v548_v2  ;;  %510 = vmatprep.subr.bf16.mxu1 %v548_v2  ;;  %s441_s15 = sld [smem:[#allocation2 + $0x6]]  ;;  %s613_s17 = sld [smem:[#allocation2 + $0x3]] }
  0x21   :  { %s442_s16 = sld [smem:[#allocation4 + $0x6]]  ;;  %s615_s18 = sld [smem:[#allocation4 + $0x3]] }
  0x22   :  { %478 = vmatmul.mubr.msk.f32.vlgmr.msra.gmra.mrb[0].mxu0 %vm60_vm1, %v45_v7  ;;  %s617_s19 = sld [smem:[#allocation2 + $0x2]]  ;;  %s621_s21 = sld [smem:[#allocation2 + $0x7]] }
  0x23   :  { %509 = vmatpush3.bf16.msra.mxu0 %v508_v8  ;;  %491 = vmatprep.mubr.msk.f32.mxu0 %vm549_vm0, %v550_v4  ;;  %s619_s20 = sld [smem:[#allocation4 + $0x2]]  ;;  %s623_s22 = sld [smem:[#allocation4 + $0x7]]  ;;  %v47_v11 = vstv %s46_s11  ;;  %v135_v15 = vstv %s439_s2 }
  0x24   :  { %s625_s23 = sld [smem:[#allocation2 + $0x8]]  ;;  %v50_v12 = vstv %s436_s12  ;;  %v139_v16 = vstv %s440_s3  ;;  %v48_v19 = vmul.f32 %v47_v11, %v45_v7  ;;  %s456_s25 = sld [smem:[#allocation2 + $0x4]] }
  0x25   :  { %s627_s24 = sld [smem:[#allocation4 + $0x8]]  ;;  %v53_v13 = vstv %s52_s13  ;;  %v56_v14 = vstv %s437_s14  ;;  %v51_v20 = vmul.f32 %v50_v12, %v45_v7  ;;  %s457_s26 = sld [smem:[#allocation4 + $0x4]] }
  0x26   :  { %v143_v17 = vstv %s441_s15  ;;  %v54_v21 = vmul.f32 %v53_v13, %v45_v7  ;;  %v57_v22 = vmul.f32 %v56_v14, %v45_v7  ;;  %v315_v30 = vstv %s613_s17  ;;  %s458_s0 = sld [smem:[#allocation2 + $0x9]] }
  0x27   :  { %v147_v18 = vstv %s442_s16  ;;  %v319_v38 = vstv %s615_s18  ;;  %s459_s1 = sld [smem:[#allocation4 + $0x9]] }
  0x28   :  { %v226_v32 = vstv %s617_s19  ;;  %v234_v34 = vstv %s621_s21 }
  0x29   :  { %v230_v33 = vstv %s619_s20  ;;  %v238_v35 = vstv %s623_s22 }
  0x2a   :  { %v323_v39 = vstv %s625_s23  ;;  %v406_v0 = vstv %s456_s25 }
  0x2b   :  { %v327_v40 = vstv %s627_s24  ;;  %v410_v1 = vstv %s457_s26 }
  0x2c   :  { %v414_v2 = vstv %s458_s0 }
  0x2d   :  { %v418_v3 = vstv %s459_s1 }
  0xf5   :  { %v606_v9 = vpop.f32.mrb[0].mxu0 }
  0xf6   :  { %v479_v10 = vpop.f32.mrb[1].mxu0  ;;  %485 = vmatmul.mubr.msk.f32.vlgmr.msra.gmra.mrb[0].mxu1 %vm60_vm1, %v606_v9  ;;  %492 = vmatmul.mubr.msk.f32.vlgmr.msra.gmra.mrb[2].mxu0 %vm60_vm1, %v606_v9  ;;  %v136_v23 = vmul.f32 %v135_v15, %v606_v9  ;;  %v140_v24 = vmul.f32 %v139_v16, %v606_v9  ;;  %v144_v25 = vmul.f32 %v143_v17, %v606_v9 }
  0xf7   :  { %512 = vmatpush3.bf16.msra.mxu1 %v508_v8  ;;  %498 = vmatprep.mubr.msk.f32.mxu1 %vm549_vm0, %v550_v4  ;;  %v148_v26 = vmul.f32 %v147_v18, %v606_v9  ;;  %v421_v10 = vld [vmem:[%s656_s4] sm:$0xf] }
  0xf8   :  { %v137_v41 = vadd.f32 %v136_v23, %v48_v19  ;;  %v141_v42 = vadd.f32 %v140_v24, %v54_v21  ;;  %v145_v43 = vadd.f32 %v144_v25, %v51_v20 }
  0xf9   :  { %v149_v44 = vadd.f32 %v148_v26, %v57_v22 }
 0x1c9   :  { %v219_v27 = vpop.f32.mrb[0].mxu1  ;;  %v310_v29 = vpop.f32.mrb[2].mxu0 }
 0x1ca   :  { %v223_v28 = vmul.f32 2.0, %v219_v27  ;;  %v486_v31 = vpop.f32.mrb[1].mxu1  ;;  %v493_v36 = vpop.f32.mrb[3].mxu0  ;;  %499 = vmatmul.mubr.msk.f32.vlgmr.msra.gmra.mrb[2].mxu1 %vm60_vm1, %v310_v29  ;;  %v316_v49 = vmul.f32 %v315_v30, %v310_v29  ;;  %v320_v50 = vmul.f32 %v319_v38, %v310_v29  ;;  %v324_v51 = vmul.f32 %v323_v39, %v310_v29 }
 0x1cb   :  { %v328_v52 = vmul.f32 %v327_v40, %v310_v29 }
 0x1cc   :  { %v224_v37 = vsub.f32 %v223_v28, %v45_v7 }
 0x1ce   :  { %v227_v45 = vmul.f32 %v226_v32, %v224_v37  ;;  %v231_v46 = vmul.f32 %v230_v33, %v224_v37  ;;  %v235_v47 = vmul.f32 %v234_v34, %v224_v37  ;;  %v239_v48 = vmul.f32 %v238_v35, %v224_v37 }
 0x1d0   :  { %v228_v53 = vadd.f32 %v227_v45, %v137_v41  ;;  %v232_v54 = vadd.f32 %v231_v46, %v141_v42  ;;  %v236_v55 = vadd.f32 %v235_v47, %v145_v43  ;;  %v240_v56 = vadd.f32 %v239_v48, %v149_v44 }
 0x1d2   :  { %v317_v57 = vadd.f32 %v316_v49, %v228_v53  ;;  %v321_v58 = vadd.f32 %v320_v50, %v232_v54  ;;  %v325_v59 = vadd.f32 %v324_v51, %v236_v55  ;;  %v329_v60 = vadd.f32 %v328_v52, %v240_v56 }
 0x29d   :  { %v399_v61 = vpop.f32.mrb[2].mxu1 }
 0x29e   :  { %v403_v62 = vmul.f32 2.0, %v399_v61  ;;  %v500_v63 = vpop.f32.mrb[3].mxu1 }
 0x2a0   :  { %v404_v4 = vsub.f32 %v403_v62, %v606_v9 }
 0x2a2   :  { %v407_v5 = vmul.f32 %v406_v0, %v404_v4  ;;  %v411_v6 = vmul.f32 %v410_v1, %v404_v4  ;;  %v415_v7 = vmul.f32 %v414_v2, %v404_v4  ;;  %v419_v8 = vmul.f32 %v418_v3, %v404_v4 }
 0x2a4   :  { %v408_v11 = vadd.f32 %v407_v5, %v317_v57  ;;  %v412_v12 = vadd.f32 %v411_v6, %v321_v58  ;;  %v416_v13 = vadd.f32 %v415_v7, %v325_v59  ;;  %v420_v14 = vadd.f32 %v419_v8, %v329_v60 }
 0x2a6   :  { %v422_v15 = vmul.f32 %v421_v10, %v412_v12  ;;  %v426_v16 = vmul.f32 %v421_v10, %v420_v14 }
 0x2a8   :  { %v423_v17 = vadd.f32 %v422_v15, %v408_v11  ;;  %v427_v18 = vadd.f32 %v426_v16, %v416_v13 }
 0x2aa   :  { %425 = vst.msk [vmem:[%s657_s5] sm:$0xf] %vm424_vm2, %v423_v17  ;;  %460 = vst.msk [vmem:[%s657_s5 + $0x4] sm:$0xf] %vm424_vm2, %v427_v18 }
 0x2ab   :  { %434 = vsyncpa [#allocation3], 1 }
 0x2ac   :  { %435 = vsyncpa [#allocation5], 1 }

</bundles_post_ra>
